<compile_context>
chip_gen: v7x
topology: tpu7x:2x2x1
jax: 0.10.0
libtpu: 0.0.40
codegen_flags: <defaults>
</compile_context>

<pallas_src>
import jax
import jax.numpy as jnp
from jax.experimental import pallas as pl
from jax.experimental.pallas import tpu as pltpu


def _emit_labels(logits, labels_ref, num_real_classes):
    """predict(): argmax over dim 1 (class axis == lane axis), lane-dense store."""
    tm, c_pad = logits.shape
    col = jax.lax.broadcasted_iota(jnp.int32, logits.shape, 1)       # [tm, Cp]
    row_max = jnp.max(logits, axis=1, keepdims=True)                 # [tm, 1]
    # First-occurrence tie-break: max-compare + min-index reduce (XLU).
    idx = jnp.where(logits == row_max, col, jnp.int32(c_pad))        # [tm, Cp]
    labels = jnp.min(idx, axis=1)                                    # [tm] i32
    # NaN guard: an all-NaN row produces no match -> class 0 (argmax convention).
    labels = jnp.where(labels >= num_real_classes, jnp.int32(0), labels)
    # Lane-dense store: batch rows on the lane axis -> one row store.
    labels_ref[...] = labels.reshape(1, tm)


def _make_kernel_resident(write_logits: bool, num_classes: int):
    """W/bias resident in VMEM, grid=(nb,): one dot + epilogue per B-tile."""

    def kernel(x_ref, w_ref, b_ref, *outs):
        if write_logits:
            logits_ref, labels_ref = outs
        else:
            (labels_ref,) = outs

        # forward (stand-in linear head): bf16 operands cast in-kernel for the
        # MXU, f32 accumulation; bias add / argmax stay in f32 on the VPU/XLU.
        logits = (
            jnp.dot(
                x_ref[...].astype(jnp.bfloat16),
                w_ref[...].astype(jnp.bfloat16),
                preferred_element_type=jnp.float32,
            )
            + b_ref[...]
        )
        if write_logits:
            logits_ref[...] = logits
        _emit_labels(logits, labels_ref, num_classes)

    return kernel


def _make_kernel_ktiled(write_logits: bool, num_classes: int):
    """Fallback when W does not fit VMEM: grid=(nb, nk), K reduction last.

    When logits are returned, accumulation happens directly in the resident f32
    logits output block (no scratch); otherwise a VMEM scratch accumulator is
    used.  Bias is folded into the k==0 init.
    """

    def kernel(x_ref, w_ref, b_ref, *refs):
        if write_logits:
            logits_ref, labels_ref = refs
            acc_ref = logits_ref
        else:
            labels_ref, acc_ref = refs

        k = pl.program_id(1)

        @pl.when(k == 0)
        def _():
            acc_ref[...] = jnp.broadcast_to(b_ref[...], acc_ref.shape)

        acc_ref[...] += jnp.dot(
            x_ref[...].astype(jnp.bfloat16),
            w_ref[...].astype(jnp.bfloat16),
            preferred_element_type=jnp.float32,
        )

        @pl.when(k == pl.num_programs(1) - 1)
        def _():
            _emit_labels(acc_ref[...], labels_ref, num_classes)

    return kernel


def _pick_tm(B: int) -> int:
    """B-tile: as large as reasonable (HBM roofline / MXU fill) while leaving
    nb >= 2 when possible so the 'parallel' axis can shard across v7x's 2 TCs."""
    if B <= 8:
        return B
    cap = min(512, B // 2)
    for t in range(cap - cap % 8, 0, -8):  # multiples of 8 (sublane), descending
        if B % t == 0:
            return t
    return B  # no suitable divisor: fall back to a single full tile


def _pick_tk(D: int, c_pad: int, budget_bytes: int) -> int:
    """K-tile for the fallback path: divisor of D, multiple of 128 (lane
    constraint) unless it is D itself; largest whose double-buffered f32 W tile
    fits half the budget."""
    cands = [t for t in range(D, 0, -1) if D % t == 0 and (t % 128 == 0 or t == D)]
    for t in cands:
        if 2 * t * c_pad * 4 <= budget_bytes // 2:
            return t
    return cands[-1]  # smallest legal tile; may exceed the soft budget


def small_model_predict(
    x, w, b, *, return_logits=True, tm=None, vmem_budget_bytes=24 * 1024 * 1024
):
    """Mirrors SmallModel.predict on a linear-head forward.

    Returns (logits [B, C] f32, labels [B] i32) when return_logits=True,
    otherwise just labels [B] i32 (logits never leave VMEM).
    """
    B, D = x.shape
    Dw, C = w.shape
    assert D == Dw and b.shape == (C,)

    # Keep f32 at the HBM boundary; bf16 casts happen inside the kernel.
    x = x.astype(jnp.float32)
    w = w.astype(jnp.float32)
    b = b.astype(jnp.float32)

    # Pad the class axis to a lane multiple; padded columns get a huge negative
    # bias so they can never win the argmax and padded-lane reductions are safe.
    c_pad = ((C + 127) // 128) * 128
    if c_pad != C:
        w = jnp.pad(w, ((0, 0), (0, c_pad - C)))
        b = jnp.pad(b, (0, c_pad - C), constant_values=-1e30)
    b2 = b.reshape(1, c_pad)

    if tm is None:
        tm = _pick_tm(B)
    assert B % tm == 0, "B must be divisible by the chosen B-tile"
    nb = B // tm

    # VMEM budget check (v7x: 64 MiB physical / 32 MiB default scoped):
    # resident W + x tile + logits tile, conservatively double-buffered.
    resident_bytes = (2 * D * c_pad + 2 * tm * D + 2 * tm * c_pad) * 4
    use_resident = resident_bytes <= vmem_budget_bytes

    labels_shape = jax.ShapeDtypeStruct((nb, tm), jnp.int32)

    if use_resident:
        grid = (nb,)
        in_specs = [
            pl.BlockSpec((tm, D), lambda i: (i, 0)),       # x tile (f32)
            pl.BlockSpec((D, c_pad), lambda i: (0, 0)),    # W: resident, DMA'd once
            pl.BlockSpec((1, c_pad), lambda i: (0, 0)),    # bias: resident
        ]
        labels_spec = pl.BlockSpec((1, tm), lambda i: (i, 0))
        logits_spec = pl.BlockSpec((tm, c_pad), lambda i: (i, 0))
        kernel = _make_kernel_resident(return_logits, C)
        scratch_shapes = []
        dim_sem = ("parallel",)
    else:
        tk = _pick_tk(D, c_pad, vmem_budget_bytes)
        nk = D // tk
        grid = (nb, nk)
        in_specs = [
            pl.BlockSpec((tm, tk), lambda i, k: (i, k)),
            pl.BlockSpec((tk, c_pad), lambda i, k: (k, 0)),
            pl.BlockSpec((1, c_pad), lambda i, k: (0, 0)),
        ]
        labels_spec = pl.BlockSpec((1, tm), lambda i, k: (i, 0))
        logits_spec = pl.BlockSpec((tm, c_pad), lambda i, k: (i, 0))
        kernel = _make_kernel_ktiled(return_logits, C)
        # Accumulate directly into the resident f32 logits block when it exists;
        # otherwise allocate a VMEM scratch accumulator.
        scratch_shapes = (
            [] if return_logits else [pltpu.VMEM((tm, c_pad), jnp.float32)]
        )
        dim_sem = ("parallel", "arbitrary")

    if return_logits:
        out_shape = (jax.ShapeDtypeStruct((B, c_pad), jnp.float32), labels_shape)
        out_specs = (logits_spec, labels_spec)
    else:
        out_shape = labels_shape
        out_specs = labels_spec

    bytes_accessed = (x.size + w.size + b2.size + nb * tm) * 4 + (
        B * c_pad * 4 if return_logits else 0
    )
    cost = pl.CostEstimate(
        flops=2 * B * D * c_pad, transcendentals=0, bytes_accessed=bytes_accessed
    )

    out = pl.pallas_call(
        kernel,
        out_shape=out_shape,
        grid=grid,
        in_specs=in_specs,
        out_specs=out_specs,
        scratch_shapes=scratch_shapes,
        compiler_params=pltpu.CompilerParams(dimension_semantics=dim_sem),
        cost_estimate=cost,
    )(x, w, b2)

    if return_logits:
        logits, labels2d = out
        if c_pad != C:
            logits = logits[:, :C]
        return logits, labels2d.reshape(-1)
    return out.reshape(-1)


if __name__ == "__main__":
    key = jax.random.PRNGKey(0)

    def reference(x, w, b):
        # Mirrors the kernel's numerics: bf16 operands, f32 accumulation.
        logits = (
            jnp.dot(
                x.astype(jnp.bfloat16),
                w.astype(jnp.bfloat16),
                preferred_element_type=jnp.float32,
            )
            + b
        )
        return logits, jnp.argmax(logits, axis=1).astype(jnp.int32)

    # --- 1) Small SmallModel-class shapes -> resident-W path, grid=(nb,). ---
    B, D, C = 8, 32, 128
    k1, k2, k3, key = jax.random.split(key, 4)
    x = jax.random.normal(k1, (B, D), jnp.float32)
    w = jax.random.normal(k2, (D, C), jnp.float32) * 0.05
    b = jax.random.normal(k3, (C,), jnp.float32) * 0.01

    logits, labels = small_model_predict(x, w, b, return_logits=True)
    jax.block_until_ready((logits, labels))
    labels_only = jax.block_until_ready(
        small_model_predict(x, w, b, return_logits=False)
    )

    ref_logits, ref_labels = reference(x, w, b)
    assert jnp.allclose(logits, ref_logits, atol=1e-4, rtol=1e-4)
    assert jnp.array_equal(labels, ref_labels)
    assert jnp.array_equal(labels_only, ref_labels)

    # --- 2) Larger shapes + tiny VMEM budget -> K-tiled fallback path, and a
    #        non-128-multiple class count to exercise the lane padding. ---
    B2, D2, C2 = 16, 256, 192
    k1, k2, k3, key = jax.random.split(key, 4)
    x2 = jax.random.normal(k1, (B2, D2), jnp.float32)
    w2 = jax.random.normal(k2, (D2, C2), jnp.float32) * 0.05
    b2 = jax.random.normal(k3, (C2,), jnp.float32) * 0.01

    logits2, labels2 = small_model_predict(
        x2, w2, b2, return_logits=True, vmem_budget_bytes=64 * 1024
    )
    jax.block_until_ready((logits2, labels2))
    labels2_only = jax.block_until_ready(
        small_model_predict(x2, w2, b2, return_logits=False, vmem_budget_bytes=64 * 1024)
    )

    ref_logits2, ref_labels2 = reference(x2, w2, b2)
    assert jnp.allclose(logits2, ref_logits2, atol=2e-3, rtol=2e-3)
    assert jnp.array_equal(labels2, ref_labels2)
    assert jnp.array_equal(labels2_only, ref_labels2)

    # predict() returns labels as a Python list.
    predict_labels = labels.tolist()
    assert isinstance(predict_labels, list) and len(predict_labels) == B

    print("KERNEL_OK")
</pallas_src>

<mosaic_0001>
module attributes {stable_mosaic.version = 11 : i64} {
  func.func @kernel(%arg0: i32, %arg1: memref<8x32xf32, #tpu.memory_space<vmem>>, %arg2: memref<32x128xf32, #tpu.memory_space<vmem>>, %arg3: memref<1x128xf32, #tpu.memory_space<vmem>>, %arg4: memref<8x128xf32, #tpu.memory_space<vmem>>, %arg5: memref<1x8xi32, #tpu.memory_space<vmem>>) attributes {dimension_semantics = [#tpu.dimension_semantics<parallel>], iteration_bounds = array<i64: 1>, scalar_prefetch = 0 : i64, scratch_operands = 0 : i64, tpu.core_type = #tpu.core_type<tc>, window_params = [{transform_indices = @transform_0, window_bounds = array<i64: 8, 32>}, {pipeline_mode = #tpu.pipeline_mode<synchronous>, transform_indices = @transform_1, window_bounds = array<i64: 32, 128>}, {pipeline_mode = #tpu.pipeline_mode<synchronous>, transform_indices = @transform_2, window_bounds = array<i64: 1, 128>}, {transform_indices = @transform_3, window_bounds = array<i64: 8, 128>}, {transform_indices = @transform_4, window_bounds = array<i64: 1, 8>}]} {
    %c0 = arith.constant 0 : index
    %c0_0 = arith.constant 0 : index
    %0 = vector.load %arg1[%c0, %c0_0] : memref<8x32xf32, #tpu.memory_space<vmem>>, vector<8x32xf32>
    %1 = arith.truncf %0 : vector<8x32xf32> to vector<8x32xbf16>
    %c0_1 = arith.constant 0 : index
    %c0_2 = arith.constant 0 : index
    %2 = vector.load %arg2[%c0_1, %c0_2] : memref<32x128xf32, #tpu.memory_space<vmem>>, vector<32x128xf32>
    %3 = arith.truncf %2 : vector<32x128xf32> to vector<32x128xbf16>
    %cst = arith.constant dense<0.000000e+00> : vector<8x128xf32>
    %4 = tpu.matmul %1, %3, %cst {dimension_numbers = #tpu.dot_dimension_numbers<[1], [0], [0], [1], [0, 0, 1, 1], [], []>} : vector<8x32xbf16>, vector<32x128xbf16>, vector<8x128xf32> -> vector<8x128xf32>
    %c0_3 = arith.constant 0 : index
    %c0_4 = arith.constant 0 : index
    %5 = vector.load %arg3[%c0_3, %c0_4] : memref<1x128xf32, #tpu.memory_space<vmem>>, vector<1x128xf32>
    %6 = vector.broadcast %5 : vector<1x128xf32> to vector<8x128xf32>
    %7 = arith.addf %4, %6 : vector<8x128xf32>
    %c0_5 = arith.constant 0 : index
    %c0_6 = arith.constant 0 : index
    %8 = vector.load %arg4[%c0_5, %c0_6] : memref<8x128xf32, #tpu.memory_space<vmem>>, vector<8x128xf32>
    tpu.vector_store %arg4[%c0_5, %c0_6], %7 {strides = array<i32>} : memref<8x128xf32, #tpu.memory_space<vmem>>, vector<8x128xf32>,
    %9 = tpu.iota {dimensions = array<i32: 1>} : vector<8x128xi32>
    %cst_7 = arith.constant dense<0xFF800000> : vector<8xf32>
    %10 = vector.multi_reduction <maximumf>, %7, %cst_7 [1] : vector<8x128xf32> to vector<8xf32>
    %11 = vector.shape_cast %10 : vector<8xf32> to vector<8x1xf32>
    %12 = vector.broadcast %11 : vector<8x1xf32> to vector<8x128xf32>
    %13 = arith.cmpf oeq, %7, %12 : vector<8x128xf32>
    %c128_i32 = arith.constant 128 : i32
    %14 = vector.broadcast %c128_i32 : i32 to vector<8x128xi32>
    %15 = arith.select %13, %9, %14 : vector<8x128xi1>, vector<8x128xi32>
    %cst_8 = arith.constant dense<2147483647> : vector<8xi32>
    %16 = vector.multi_reduction <minsi>, %15, %cst_8 [1] : vector<8x128xi32> to vector<8xi32>
    %c128_i32_9 = arith.constant 128 : i32
    %17 = vector.broadcast %c128_i32_9 : i32 to vector<8xi32>
    %18 = arith.cmpi sge, %16, %17 : vector<8xi32>
    %c0_i32 = arith.constant 0 : i32
    %19 = vector.broadcast %c0_i32 : i32 to vector<8xi32>
    %20 = arith.select %18, %19, %16 : vector<8xi1>, vector<8xi32>
    %21 = vector.shape_cast %20 : vector<8xi32> to vector<1x8xi32>
    %c0_10 = arith.constant 0 : index
    %c0_11 = arith.constant 0 : index
    %22 = vector.load %arg5[%c0_10, %c0_11] : memref<1x8xi32, #tpu.memory_space<vmem>>, vector<1x8xi32>
    tpu.vector_store %arg5[%c0_10, %c0_11], %21 {strides = array<i32>} : memref<1x8xi32, #tpu.memory_space<vmem>>, vector<1x8xi32>,
    return
  }
  func.func @transform_0(%arg0: i32) -> (i32, i32) {
    %c0_i32 = arith.constant 0 : i32
    %c0_i32_0 = arith.constant 0 : i32
    return %arg0, %c0_i32 : i32, i32
  }
  func.func @transform_1(%arg0: i32) -> (i32, i32) {
    %c0_i32 = arith.constant 0 : i32
    %c0_i32_0 = arith.constant 0 : i32
    %c0_i32_1 = arith.constant 0 : i32
    return %c0_i32, %c0_i32_0 : i32, i32
  }
  func.func @transform_2(%arg0: i32) -> (i32, i32) {
    %c0_i32 = arith.constant 0 : i32
    %c0_i32_0 = arith.constant 0 : i32
    %c0_i32_1 = arith.constant 0 : i32
    return %c0_i32, %c0_i32_0 : i32, i32
  }
  func.func @transform_3(%arg0: i32) -> (i32, i32) {
    %c0_i32 = arith.constant 0 : i32
    %c0_i32_0 = arith.constant 0 : i32
    return %arg0, %c0_i32 : i32, i32
  }
  func.func @transform_4(%arg0: i32) -> (i32, i32) {
    %c0_i32 = arith.constant 0 : i32
    %c0_i32_0 = arith.constant 0 : i32
    return %arg0, %c0_i32 : i32, i32
  }
}

</mosaic_0001>

<bundles_post_ra>
// kernel: tpu_custom_call.1
= control target key start
LH: loop header
LB: loop body
LE: loop exit
PB: predicated region body
PF: predicated region fallthrough
CT: control target
= control target key end

     0   :  { %10 = vsyncpa [#allocation3], 0  ;;  %s371_s0 = inlined_call_operand.hbm [shape: f32[8,32], index: 0, kind: input, shape index: {}]   ;;  %s372_s1 = inlined_call_operand.hbm [shape: f32[32,128], index: 1, kind: input, shape index: {}]   ;;  %s373_s2 = inlined_call_operand.vmem [shape: f32[1,128], index: 2, kind: input, shape index: {}]   ;;  %s374_s3 = inlined_call_operand.hbm [shape: f32[8,128], index: 3, kind: output, shape index: {0}]   ;;  %s375_s4 = inlined_call_operand.hbm [shape: s32[1,8], index: 4, kind: output, shape index: {1}]  }
   0x1   :  { %11 = vsyncpa [#allocation6], 0 }
   0x2   :  { %12 = vsyncpa [#allocation4], 0 }
   0x3   :  { %13 = vsyncpa [#allocation9], 0  ;;  %s280_s15 = smov [#allocation2]   ;;  %s281_s17 = smov [#allocation5]  }
   0x4   :  { %s20_s16 = sshll.u32 %s280_s15, 4  ;;  %s29_s18 = sshll.u32 %s281_s17, 4  ;;  %s21_s16 = int_to_ptr.vmem [resolvable:$true] %s20_s16  ;;  %s313_s18 = int_to_ptr.vmem [resolvable:$true] %s29_s18 }
   0x5   :  { %s184_s21 = scalar_lea.hbm %s371_s0, 128 }
   0x6   :  { %p185_p0 = scmp.ne.s32.totalorder %s371_s0, %s184_s21  ;;  %p188_p1 = scmp.lt.u32.totalorder %s184_s21, %s371_s0 }
   0x8   :  { %p190_p2 = pnand %p188_p1, %p185_p0 }
   0xa   :  { %193 = shalt.err (!%p190_p2)
}
   0xb   :  { %s194_s26 = scalar_lea.vmem %s21_s16, 128  ;;  %p199_p4 = scmp.lt.s32.totalorder %s21_s16, %s21_s16 }
   0xc   :  { %p195_p3 = scmp.ne.s32.totalorder %s21_s16, %s194_s26  ;;  %p200_p5 = scmp.lt.s32.totalorder %s194_s26, %s194_s26 }
   0xe   :  { %p201_p6 = por %p200_p5, %p199_p4 }
  0x10   :  { %p202_p7 = pnand %p201_p6, %p195_p3 }
  0x12   :  { %205 = shalt.err (!%p202_p7)
}
  0x13   :  { %23 = dma.hbm_to_vmem [thread:$0]  %s371_s0, 128, %s21_s16, [#allocation3]  }
  0x14   :  { %s206_s5 = scalar_lea.hbm %s372_s1, 512 }
  0x15   :  { %p207_p8 = scmp.ne.s32.totalorder %s372_s1, %s206_s5  ;;  %p210_p9 = scmp.lt.u32.totalorder %s206_s5, %s372_s1 }
  0x17   :  { %p212_p10 = pnand %p210_p9, %p207_p8 }
  0x19   :  { %215 = shalt.err (!%p212_p10)
}
  0x1a   :  { %s216_s10 = scalar_lea.vmem %s313_s18, 512  ;;  %p221_p12 = scmp.lt.s32.totalorder %s313_s18, %s313_s18 }
  0x1b   :  { %p217_p11 = scmp.ne.s32.totalorder %s313_s18, %s216_s10  ;;  %p222_p13 = scmp.lt.s32.totalorder %s216_s10, %s216_s10 }
  0x1d   :  { %p223_p0 = por %p222_p13, %p221_p12 }
  0x1f   :  { %p224_p1 = pnand %p223_p0, %p217_p11 }
  0x21   :  { %227 = shalt.err (!%p224_p1)
}
  0x22   :  { %s282_s0 = smov 128   ;;  %s283_s11 = smov 8  }
  0x23   :  { %35 = dma.hbm_to_vmem [thread:$0]  %s372_s1, 512, %s313_s18, [#allocation6], %s282_s0, %s282_s0, %s283_s11  }
  0x24   :  { %272 = dma.done.wait [#allocation3], 128  }
  0x25   :  { %273 = vsyncadd [#allocation3], 4294967168 }
  0x26   :  { %274 = dma.done.wait [#allocation6], 512  }
  0x27   :  { %275 = vsyncadd [#allocation6], 4294966784  ;;  %v284_v0 = vmov 0.0   ;;  %vm285_vm0 = vmmov 0   ;;  %v47_v1 = vld [vmem:[#allocation5] sm:$0xff]  ;;  %v48_v2 = vld [vmem:[#allocation5 + $0x8] sm:$0xff]  ;;  %v105_v15 = vlaneseq }
  0x28   :  { %168 = vmatprep.subr.bf16.mxu0 %v284_v0  ;;  %172 = vmatprep.mubr.msk.bf16.mxu0 %vm285_vm0, %v284_v0  ;;  %v49_v3 = vld [vmem:[#allocation5 + $0x10] sm:$0xff]  ;;  %v51_v4 = vpack.c.bf16 %v48_v2, %v47_v1  ;;  %v50_v5 = vld [vmem:[#allocation5 + $0x18] sm:$0xff]  ;;  %vm60_vm1 = vcmask 261120  }
  0x29   :  { %v52_v6 = vpack.c.bf16 %v50_v5, %v49_v3  ;;  %v45_v7 = vld [vmem:[#allocation2] sm:$0xff]  ;;  %v106_v16 = vand.u32 127, %v105_v15 }
  0x2a   :  { %169 = vmatpush3.bf16.msra.mxu0 %v51_v4  ;;  %v46_v8 = vpack.c.bf16 %v45_v7, %v45_v7  ;;  %v163_v9 = vld [vmem:[%s373_s2] ss:$0 sm:$0xff]  ;;  %s286_s2 = smov [#allocation7]  }
  0x2b   :  { %170 = vmatprep.subr.bf16.mxu0 %v284_v0  ;;  %s139_s15 = sshll.u32 %s286_s2, 4  ;;  %s140_s15 = int_to_ptr.vmem [resolvable:$true] %s139_s15 }
  0x2c   :  { %s228_s16 = scalar_lea.vmem %s140_s15, 128  ;;  %p233_p3 = scmp.lt.s32.totalorder %s140_s15, %s140_s15 }
  0x2d   :  { %p229_p2 = scmp.ne.s32.totalorder %s140_s15, %s228_s16  ;;  %p234_p4 = scmp.lt.s32.totalorder %s228_s16, %s228_s16 }
  0x2e   :  { %171 = vmatpush3.bf16.msra.mxu0 %v52_v6 }
  0x2f   :  { %p235_p5 = por %p234_p4, %p233_p3 }
  0x31   :  { %173 = vmatmul.mubr.msk.bf16.vlgmr.msra.gmra.mrb[0].mxu0 %vm60_vm1, %v46_v8  ;;  %p236_p6 = pnand %p235_p5, %p229_p2 }
 0x104   :  { %v98_v10 = vpop.f32.mrb[0].mxu0 }
 0x105   :  { %v99_v11 = vadd.f32 %v163_v9, %v98_v10  ;;  %v174_v12 = vpop.f32.mrb[1].mxu0 }
 0x106   :  { %v101_v13 = vpop.f32.mrb[2].mxu0 }
 0x107   :  { %104 = vst [vmem:[#allocation7] sm:$0xff] %v99_v11  ;;  %107 = vmax.xlane.f32.xlu0 %v99_v11  ;;  %v175_v14 = vpop.f32.mrb[3].mxu0 }
 0x194   :  { %v108_v17 = vpop.xlane.xlu0 %107 }
 0x195   :  { %vm109_vm2 = vcmp.eq.f32.partialorder %v99_v11, %v108_v17 }
 0x196   :  { %v110_v18 = vsel %vm109_vm2, %v106_v16, 128 }
 0x197   :  { %v112_v19 = vshra.s32 %v110_v18, 16  ;;  %v111_v21 = vand.u32 65535, %v110_v18 }
 0x199   :  { %v114_v20 = vcvt.s32.f32 %v112_v19  ;;  %v113_v23 = vcvt.s32.f32 %v111_v21 }
 0x19b   :  { %115 = vmin.xlane.f32.xlu0 %v114_v20 }
 0x228   :  { %v116_v22 = vpop.xlane.xlu0 %115 }
 0x229   :  { %vm117_vm3 = vcmp.eq.f32.partialorder %v114_v20, %v116_v22 }
 0x22a   :  { %v118_v24 = vsel %vm117_vm3, %v113_v23, inf }
 0x22b   :  { %119 = vmin.xlane.f32.xlu1 %v118_v24 }
 0x22c   :  { %239 = shalt.err (!%p236_p6)
}
 0x22d   :  { %s240_s19 = scalar_lea.hbm %s374_s3, 128 }
 0x22e   :  { %p241_p7 = scmp.ne.s32.totalorder %s374_s3, %s240_s19  ;;  %p244_p8 = scmp.lt.u32.totalorder %s240_s19, %s374_s3 }
 0x230   :  { %p246_p9 = pnand %p244_p8, %p241_p7 }
 0x232   :  { %249 = shalt.err (!%p246_p9)
}
 0x233   :  { %142 = dma.vmem_to_hbm [thread:$0]  %s140_s15, 128, %s374_s3, [#allocation4]   ;;  %v122_v25 = vcvt.f32.s32 %v116_v22  ;;  %v128_v26 = vshrl.u32 %v105_v15, 7  ;;  %vm131_vm5 = vcmask 57344  }
 0x234   :  { %s287_s26 = smov [#allocation8]  }
 0x235   :  { %v123_v28 = vshll.u32 %v122_v25, 16  ;;  %v129_v30 = vsub.s32 %v106_v16, %v128_v26  ;;  %s149_s27 = sshll.u32 %s287_s26, 4  ;;  %s150_s27 = int_to_ptr.vmem [resolvable:$true] %s149_s27 }
 0x236   :  { %s250_s28 = scalar_lea.vmem %s150_s27, 16  ;;  %s254_s29 = scalar_lea.vmem %s150_s27, 32 }
 0x237   :  { %p251_p10 = scmp.ne.s32.totalorder %s150_s27, %s250_s28  ;;  %p255_p11 = scmp.lt.s32.totalorder %s150_s27, %s150_s27 }
 0x238   :  { %p256_p12 = scmp.lt.s32.totalorder %s254_s29, %s250_s28 }
 0x23a   :  { %p257_p13 = por %p256_p12, %p255_p11 }
 0x23c   :  { %p258_p0 = pnand %p257_p13, %p251_p10 }
 0x2b8   :  { %v120_v27 = vpop.xlane.xlu1 %119 }
 0x2b9   :  { %v121_v29 = vcvt.f32.s32 %v120_v27 }
 0x2bb   :  { %v124_v31 = vadd.s32 %v123_v28, %v121_v29 }
 0x2bd   :  { %vm125_vm4 = vcmp.ge.s32.totalorder %v124_v31, 128 }
 0x2be   :  { %v126_v32 = vsel %vm125_vm4, 0, %v124_v31 }
 0x2bf   :  { %v130_v33 = vrot.slane %v126_v32, %v129_v30 }
 0x2c1   :  { %132 = vst.msk [vmem:[#allocation8] sm:$0x1] %vm131_vm5, %v130_v33 }
 0x2c2   :  { %261 = shalt.err (!%p258_p0)
}
 0x2c3   :  { %s262_s5 = scalar_lea.hbm %s375_s4, 16 }
 0x2c4   :  { %p263_p1 = scmp.ne.s32.totalorder %s375_s4, %s262_s5  ;;  %p266_p2 = scmp.lt.u32.totalorder %s262_s5, %s375_s4 }
 0x2c6   :  { %p268_p3 = pnand %p266_p2, %p263_p1 }
 0x2c8   :  { %271 = shalt.err (!%p268_p3)
}
 0x2c9   :  { %152 = dma.vmem_to_hbm [thread:$0]  %s150_s27, 16, %s375_s4, [#allocation9]  }
 0x2ca   :  { %276 = dma.done.wait [#allocation4], 128  }
 0x2cb   :  { %277 = vsyncadd [#allocation4], 4294967168 }
 0x2cc   :  { %278 = dma.done.wait [#allocation9], 16  }
 0x2cd   :  { %279 = vsyncadd [#allocation9], 4294967280 }
 0x2ce   :  { %159 = vsyncpa [#allocation3], 1 }
 0x2cf   :  { %160 = vsyncpa [#allocation6], 1 }
 0x2d0   :  { %161 = vsyncpa [#allocation4], 1 }
 0x2d1   :  { %162 = vsyncpa [#allocation9], 1 }

</bundles_post_ra>
